<compile_context>
chip_gen: v7x
topology: tpu7x:2x2x1
jax: 0.10.0
libtpu: 0.0.40
codegen_flags: <defaults>
</compile_context>

<pallas_src>
import math

import numpy as np
import jax
import jax.numpy as jnp
from jax.experimental import pallas as pl
from jax.experimental.pallas import tpu as pltpu


# --------------------------------------------------------------------------- #
# Pallas kernel: second-moment lane sums for one (query-tile, negative-slot)
# --------------------------------------------------------------------------- #
def _btl_moments_kernel(muA_ref, muP_ref, muN_ref, base_ref, neg_ref):
    """Grid = (query row-tiles, S-2 negative slots).

    muA_ref, muP_ref : (TQ, Dm)     resident across the slot axis (same block index)
    muN_ref          : (1, TQ, Dm)  one negative slab streamed per grid step
    base_ref         : (TQ, 3)      [sum muA^2, sum muP^2, sum muA*muP], resident
    neg_ref          : (1, TQ, 3)   [sum muN^2, sum muA*muN, sum muP*muN] for this slot

    Every variance term of the loss is a per-triplet scalar broadcast over the
    feature axis, so it factors out of the lane reduction and never enters the
    kernel; it is recombined in the cheap O(nq*(S-2)) plain-JAX tail.
    """
    s = pl.program_id(1)
    f32 = jnp.float32
    muA = muA_ref[...].astype(f32)            # upcast is a no-op for f32 storage
    muP = muP_ref[...].astype(f32)
    muN = muN_ref[0, :, :].astype(f32)        # (TQ, Dm)

    # Base moments depend only on the query tile: compute once per row-tile.
    @pl.when(s == 0)
    def _():
        base_ref[...] = jnp.concatenate(
            [jnp.sum(muA * muA, axis=-1, keepdims=True),
             jnp.sum(muP * muP, axis=-1, keepdims=True),
             jnp.sum(muA * muP, axis=-1, keepdims=True)], axis=-1)

    # Single wide store per step (no per-column 1-lane masked stores).
    # TODO(synk): if profiling ever shows the XLU lane-reduce binding (Dm ~ 128),
    # switch these jnp.sum reductions to jnp.dot(prod, ones((Dm, 1))) on the idle MXU.
    neg_ref[0, :, :] = jnp.concatenate(
        [jnp.sum(muN * muN, axis=-1, keepdims=True),
         jnp.sum(muA * muN, axis=-1, keepdims=True),
         jnp.sum(muP * muN, axis=-1, keepdims=True)], axis=-1)


# --------------------------------------------------------------------------- #
# Tile sizing helpers (generation aware: v7x has 64 MiB VMEM, v5e/v6e 128 MiB)
# --------------------------------------------------------------------------- #
def _round_up(x, m):
    return ((x + m - 1) // m) * m


def _vmem_capacity_bytes():
    try:
        info = pltpu.get_tpu_info()
        for attr in ("vmem_capacity_bytes", "vmem_size_bytes", "vmem_bytes"):
            v = getattr(info, attr, None)
            if v:
                return int(v)
    except Exception:
        pass
    try:  # device_kind fallback so v5e/v6e do not get silently halved tiles
        kind = jax.devices()[0].device_kind.lower()
        if "v5" in kind or "v6" in kind:
            return 128 * 1024 * 1024
    except Exception:
        pass
    return 64 * 1024 * 1024          # conservative (v7x-sized) last resort


def _choose_tile_q(dm, in_itemsize, budget_bytes, row_align):
    """Rows per tile; per-row VMEM is independent of S-2 (one slot streamed per step)."""
    dmp = _round_up(dm, 128)                          # lane-padded compute footprint
    per_q = (2 * 2 * dm * in_itemsize                 # muA + muP blocks, double-buffered
             + 2 * dm * in_itemsize                   # one negative slab, double-buffered
             + 2 * 2 * 128 * 4                        # the two packed outputs (lane-padded)
             + 4 * dmp * 4)                           # in-body f32 upcasts / temporaries
    t = int(budget_bytes // max(per_q, 1))
    t = max(row_align, min(4096, t))
    return max(row_align, (t // row_align) * row_align)


# --------------------------------------------------------------------------- #
# Forward pass (mirrors BayesianTripletLoss.forward, distribution='gauss')
# --------------------------------------------------------------------------- #
def bayesian_triplet_loss(x, label, *, margin, var_prior, kl_scale_factor=1e-6,
                          distribution="gauss", storage_dtype=jnp.float32,
                          tile_q=None):
    """x: (D, N) feature-major (last row = predicted variance), label in {-1, 1, 0}.

    `label` must be concrete at trace time (mirrors the PyTorch `.data` mask use).
    storage_dtype=jnp.bfloat16 halves mu-matrix HBM traffic (recommended on v5e);
    all in-kernel products and reductions stay float32.
    """
    assert distribution == "gauss", "only the 'gauss' branch is implemented"
    label = np.asarray(label)
    x = jnp.asarray(x)
    D, n_cols = x.shape
    nq = int((label == -1).sum())
    S = n_cols // nq
    Sm2 = S - 2
    assert Sm2 >= 1, "need at least one negative per tuple"
    Dm = D - 1

    a_idx = np.flatnonzero(label == -1)
    p_idx = np.flatnonzero(label == 1)
    n_idx = np.flatnonzero(label == 0)
    assert n_idx.size == nq * Sm2

    # ---- gather / layout: no f32 staging copy, no row padding ---------------------
    # Unique anchors / positives row-major (nq, Dm): no (S-2)x host-side repeat; the
    # kernel reuses each anchor/positive tile against all of its negatives.
    muA = x[:Dm, a_idx].astype(storage_dtype).T                # (nq, Dm)
    muP = x[:Dm, p_idx].astype(storage_dtype).T                # (nq, Dm)
    # Negatives grouped (slot, query, feature); the i-th negative column pairs with
    # anchor i // (S-2), exactly like the PyTorch repeat(1, S-2).view pairing.
    # TODO(synk): if the producer can emit negatives already as (Sm2, nq, Dm) (or x
    # row-major), this permute pass over the largest operand disappears entirely.
    muN = jnp.transpose(x[:Dm, n_idx].astype(storage_dtype).reshape(Dm, nq, Sm2),
                        (2, 1, 0))                             # (Sm2, nq, Dm)
    varA = x[Dm, a_idx].astype(jnp.float32)                    # (nq,)
    varP = x[Dm, p_idx].astype(jnp.float32)                    # (nq,)
    varN = x[Dm, n_idx].astype(jnp.float32).reshape(nq, Sm2)   # (nq, Sm2)

    # ---- tile size & VMEM budget ---------------------------------------------------
    itemsize = jnp.dtype(storage_dtype).itemsize
    row_align = 16 if itemsize < 4 else 8                      # bf16 packs (16, 128)
    vmem_limit = int(min(_vmem_capacity_bytes() * 3 // 4, 100 * 1024 * 1024))
    if tile_q is None:
        tile_q = _choose_tile_q(Dm, itemsize, int(vmem_limit * 0.85), row_align)
        # keep >= 2 row-tiles when possible so the "parallel" axis feeds both
        # TensorCores on v7x
        tile_q = min(tile_q, max(row_align, _round_up((nq + 1) // 2, row_align)))
    tile_q = max(row_align, (int(tile_q) // row_align) * row_align)
    tile_q = min(tile_q, _round_up(nq, row_align))
    grid_q = -(-nq // tile_q)                 # ragged last row-tile is masked by Pallas
    # Feature axis is left at its native width: each block spans the full Dm, so the
    # DMAs are already contiguous; zero-padding Dm to 128 would only add HBM bytes.

    moments_base, moments_neg = pl.pallas_call(
        _btl_moments_kernel,
        out_shape=(jax.ShapeDtypeStruct((nq, 3), jnp.float32),
                   jax.ShapeDtypeStruct((Sm2, nq, 3), jnp.float32)),
        grid=(grid_q, Sm2),
        in_specs=[
            pl.BlockSpec((tile_q, Dm), lambda i, s: (i, 0)),        # resident across s
            pl.BlockSpec((tile_q, Dm), lambda i, s: (i, 0)),        # resident across s
            pl.BlockSpec((1, tile_q, Dm), lambda i, s: (s, i, 0)),  # one slot per step
        ],
        out_specs=(
            pl.BlockSpec((tile_q, 3), lambda i, s: (i, 0)),         # resident across s
            pl.BlockSpec((1, tile_q, 3), lambda i, s: (s, i, 0)),
        ),
        compiler_params=pltpu.CompilerParams(
            # query tiles are independent -> sharded across v7x's 2 TensorCores;
            # slot axis is sequential (resident muA/muP/base output).
            dimension_semantics=("parallel", "arbitrary"),
            vmem_limit_bytes=vmem_limit,
        ),
    )(muA, muP, muN)

    # ---- O(nq * (S-2)) tail in plain JAX -------------------------------------------
    # TODO(synk): Normal.cdf needs erf, which has no guaranteed Mosaic lowering; the
    # tiny per-triplet tail (var recombination, cdf, log, means) stays outside the kernel.
    sA2 = moments_base[:, 0:1]
    sP2 = moments_base[:, 1:2]
    sAP = moments_base[:, 2:3]
    sN2 = moments_neg[:, :, 0].T                               # (nq, Sm2)
    sAN = moments_neg[:, :, 1].T
    sPN = moments_neg[:, :, 2].T

    vA = varA[:, None]
    vP = varP[:, None]
    vN = varN
    dm_f = jnp.float32(Dm)

    # mu = E[d(a,p)^2 - d(a,n)^2] per triplet
    mu = sP2 - sN2 - 2.0 * sAP + 2.0 * sAN + dm_f * (vP - vN)
    # sigma^2 = Var[d(a,p)^2 - d(a,n)^2] per triplet (variance terms recombined here)
    t1 = (dm_f * (vP * vP + 2.0 * vA * vP) + 2.0 * (vP + vA) * sP2
          + 2.0 * vP * sA2 - 4.0 * vP * sAP)
    t2 = (dm_f * (vN * vN + 2.0 * vA * vN) + 2.0 * (vN + vA) * sN2
          + 2.0 * vN * sA2 - 4.0 * vN * sAN)
    t3 = 4.0 * vA * sPN
    sigma2 = jnp.maximum(2.0 * (t1 + t2) - 2.0 * t3, 0.0)      # fp-cancellation guard
    sigma = jnp.sqrt(sigma2)

    z = (jnp.float32(margin) - mu) / ((sigma + 1e-8) * jnp.sqrt(jnp.float32(2.0)))
    probs = 0.5 * (1.0 + jax.scipy.special.erf(z))
    nll = jnp.mean(-jnp.log(probs + 1e-8))

    vp = jnp.float32(var_prior)

    def kl_gauss(sumsq, var_q):
        return 0.5 * ((var_q / vp) * dm_f + sumsq / vp - dm_f
                      + dm_f * (jnp.log(vp) - jnp.log(var_q)))

    # A / P are repeated (S-2)x in the PyTorch module, so the mean over the M
    # triplets equals the mean over the nq unique queries.
    kl = (jnp.mean(kl_gauss(sA2[:, 0], varA))
          + jnp.mean(kl_gauss(sP2[:, 0], varP))
          + jnp.mean(kl_gauss(sN2, vN)))
    return nll + kl_scale_factor * kl


# --------------------------------------------------------------------------- #
# Pure numpy mirror of the PyTorch module (feature-major, dim=0 sums)
# --------------------------------------------------------------------------- #
def _reference_loss(x, label, margin, var_prior, kl_scale):
    x = np.asarray(x, dtype=np.float64)
    label = np.asarray(label)
    D, n_cols = x.shape
    nq = int((label == -1).sum())
    S = n_cols // nq
    a_cols = np.repeat(np.flatnonzero(label == -1), S - 2)
    p_cols = np.repeat(np.flatnonzero(label == 1), S - 2)
    A = x[:, a_cols]
    P = x[:, p_cols]
    Nn = x[:, np.flatnonzero(label == 0)]
    muA, varA = A[:-1], A[-1:]
    muP, varP = P[:-1], P[-1:]
    muN, varN = Nn[:-1], Nn[-1:]
    muA2, muP2, muN2 = muA**2, muP**2, muN**2
    varP2, varN2 = varP**2, varN**2
    mu = np.sum(muP2 + varP - muN2 - varN - 2 * muA * (muP - muN), axis=0)
    T1 = varP2 + 2*muP2*varP + 2*(varA + muA2)*(varP + muP2) - 2*muA2*muP2 - 4*muA*muP*varP
    T2 = varN2 + 2*muN2*varN + 2*(varA + muA2)*(varN + muN2) - 2*muA2*muN2 - 4*muA*muN*varN
    T3 = 4 * muP * muN * varA
    sigma2 = np.sum(2*T1 + 2*T2 - 2*T3, axis=0)
    sigma = np.sqrt(np.maximum(sigma2, 0.0))          # same fp-cancellation guard
    zz = (margin - mu) / ((sigma + 1e-8) * math.sqrt(2.0))
    probs = 0.5 * (1.0 + np.vectorize(math.erf)(zz))
    nll = np.mean(-np.log(probs + 1e-8))
    Dm = muA.shape[0]

    def kl_gauss(mu_q, var_q):
        kl = 0.5 * ((var_q / var_prior) * Dm + (1.0 / var_prior) * np.sum(mu_q**2, axis=0)
                    - Dm + Dm * (np.log(var_prior) - np.log(var_q)))
        return kl.mean()

    kl = kl_gauss(muA, varA) + kl_gauss(muP, varP) + kl_gauss(muN, varN)
    return nll + kl_scale * kl


if __name__ == "__main__":
    def _run_case(D, nq, S, margin, var_prior, key, tile_q=None,
                  storage_dtype=jnp.float32, rtol=1e-4, atol=1e-4):
        n_cols = nq * S
        x = jax.random.normal(key, (D, n_cols), dtype=jnp.float32)
        # last row is the predicted variance -> make it strictly positive
        x = x.at[-1, :].set(jax.nn.softplus(x[-1, :]) + 0.1)
        # label layout per tuple: [anchor(-1), positive(1), negatives(0)*(S-2)]
        label = np.tile(np.array([-1, 1] + [0] * (S - 2), dtype=np.int32), nq)
        loss = bayesian_triplet_loss(x, label, margin=margin, var_prior=var_prior,
                                     kl_scale_factor=1e-6, distribution="gauss",
                                     storage_dtype=storage_dtype, tile_q=tile_q)
        loss = jax.block_until_ready(loss)
        ref = _reference_loss(np.asarray(x), label, margin, var_prior, 1e-6)
        assert np.isfinite(float(loss)), float(loss)
        assert np.allclose(float(loss), float(ref), rtol=rtol, atol=atol), (float(loss), float(ref))

    key = jax.random.PRNGKey(0)
    k1, k2, k3 = jax.random.split(key, 3)
    # Single-tile case: D=33 (32 mean dims + 1 variance), 4 negatives per tuple.
    _run_case(D=33, nq=8, S=6, margin=0.0, var_prior=1.0 / 32.0, key=k1)
    # Ragged multi-tile case: tile_q=8 forces grid_q=2 with a masked partial last
    # row-tile (nq=10, no host-side padding).
    _run_case(D=129, nq=10, S=7, margin=0.2, var_prior=1.0 / 128.0, key=k2, tile_q=8)
    # bf16 storage path (v5e bandwidth mode): products stay f32 in-kernel; loose
    # tolerance covers bf16 rounding of the stored mu matrices.
    _run_case(D=129, nq=16, S=5, margin=0.1, var_prior=1.0 / 128.0, key=k3,
              storage_dtype=jnp.bfloat16, rtol=0.1, atol=0.1)
    print("KERNEL_OK")
</pallas_src>

<mosaic_0001>
module attributes {stable_mosaic.version = 11 : i64} {
  func.func @_btl_moments_kernel(%arg0: i32, %arg1: i32, %arg2: memref<8x32xf32, #tpu.memory_space<vmem>>, %arg3: memref<8x32xf32, #tpu.memory_space<vmem>>, %arg4: memref<1x8x32xf32, #tpu.memory_space<vmem>>, %arg5: memref<8x3xf32, #tpu.memory_space<vmem>>, %arg6: memref<1x8x3xf32, #tpu.memory_space<vmem>>) attributes {dimension_semantics = [#tpu.dimension_semantics<parallel>, #tpu.dimension_semantics<arbitrary>], iteration_bounds = array<i64: 1, 4>, scalar_prefetch = 0 : i64, scratch_operands = 0 : i64, tpu.core_type = #tpu.core_type<tc>, window_params = [{transform_indices = @transform_0, window_bounds = array<i64: 8, 32>}, {transform_indices = @transform_1, window_bounds = array<i64: 8, 32>}, {transform_indices = @transform_2, window_bounds = array<i64: 1, 8, 32>}, {transform_indices = @transform_3, window_bounds = array<i64: 8, 3>}, {transform_indices = @transform_4, window_bounds = array<i64: 1, 8, 3>}]} {
    %c0 = arith.constant 0 : index
    %c0_0 = arith.constant 0 : index
    %0 = vector.load %arg2[%c0, %c0_0] : memref<8x32xf32, #tpu.memory_space<vmem>>, vector<8x32xf32>
    %c0_1 = arith.constant 0 : index
    %c0_2 = arith.constant 0 : index
    %1 = vector.load %arg3[%c0_1, %c0_2] : memref<8x32xf32, #tpu.memory_space<vmem>>, vector<8x32xf32>
    %c0_3 = arith.constant 0 : index
    %c0_4 = arith.constant 0 : index
    %c0_5 = arith.constant 0 : index
    %2 = vector.load %arg4[%c0_3, %c0_4, %c0_5] : memref<1x8x32xf32, #tpu.memory_space<vmem>>, vector<1x8x32xf32>
    %3 = vector.shape_cast %2 : vector<1x8x32xf32> to vector<8x32xf32>
    %c0_i32 = arith.constant 0 : i32
    %4 = arith.cmpi eq, %arg1, %c0_i32 : i32
    %5 = arith.extui %4 : i1 to i32
    %c0_i32_6 = arith.constant 0 : i32
    %6 = arith.cmpi ne, %5, %c0_i32_6 : i32
    scf.if %6 {
      %20 = arith.mulf %0, %0 : vector<8x32xf32>
      %cst_12 = arith.constant dense<0.000000e+00> : vector<8xf32>
      %21 = vector.multi_reduction <add>, %20, %cst_12 [1] : vector<8x32xf32> to vector<8xf32>
      %22 = vector.shape_cast %21 : vector<8xf32> to vector<8x1xf32>
      %23 = arith.mulf %1, %1 : vector<8x32xf32>
      %cst_13 = arith.constant dense<0.000000e+00> : vector<8xf32>
      %24 = vector.multi_reduction <add>, %23, %cst_13 [1] : vector<8x32xf32> to vector<8xf32>
      %25 = vector.shape_cast %24 : vector<8xf32> to vector<8x1xf32>
      %26 = arith.mulf %0, %1 : vector<8x32xf32>
      %cst_14 = arith.constant dense<0.000000e+00> : vector<8xf32>
      %27 = vector.multi_reduction <add>, %26, %cst_14 [1] : vector<8x32xf32> to vector<8xf32>
      %28 = vector.shape_cast %27 : vector<8xf32> to vector<8x1xf32>
      %29 = tpu.concatenate %22, %25, %28 in 1 : vector<8x1xf32>, vector<8x1xf32>, vector<8x1xf32> -> vector<8x3xf32>
      %c0_15 = arith.constant 0 : index
      %c0_16 = arith.constant 0 : index
      %30 = vector.load %arg5[%c0_15, %c0_16] : memref<8x3xf32, #tpu.memory_space<vmem>>, vector<8x3xf32>
      tpu.vector_store %arg5[%c0_15, %c0_16], %29 {strides = array<i32>} : memref<8x3xf32, #tpu.memory_space<vmem>>, vector<8x3xf32>,
    } else {
    }
    %7 = arith.mulf %3, %3 : vector<8x32xf32>
    %cst = arith.constant dense<0.000000e+00> : vector<8xf32>
    %8 = vector.multi_reduction <add>, %7, %cst [1] : vector<8x32xf32> to vector<8xf32>
    %9 = vector.shape_cast %8 : vector<8xf32> to vector<8x1xf32>
    %10 = arith.mulf %0, %3 : vector<8x32xf32>
    %cst_7 = arith.constant dense<0.000000e+00> : vector<8xf32>
    %11 = vector.multi_reduction <add>, %10, %cst_7 [1] : vector<8x32xf32> to vector<8xf32>
    %12 = vector.shape_cast %11 : vector<8xf32> to vector<8x1xf32>
    %13 = arith.mulf %1, %3 : vector<8x32xf32>
    %cst_8 = arith.constant dense<0.000000e+00> : vector<8xf32>
    %14 = vector.multi_reduction <add>, %13, %cst_8 [1] : vector<8x32xf32> to vector<8xf32>
    %15 = vector.shape_cast %14 : vector<8xf32> to vector<8x1xf32>
    %16 = tpu.concatenate %9, %12, %15 in 1 : vector<8x1xf32>, vector<8x1xf32>, vector<8x1xf32> -> vector<8x3xf32>
    %c0_9 = arith.constant 0 : index
    %c0_10 = arith.constant 0 : index
    %c0_11 = arith.constant 0 : index
    %17 = vector.load %arg6[%c0_9, %c0_10, %c0_11] : memref<1x8x3xf32, #tpu.memory_space<vmem>>, vector<1x8x3xf32>
    %18 = vector.shape_cast %17 : vector<1x8x3xf32> to vector<8x3xf32>
    %19 = vector.shape_cast %16 : vector<8x3xf32> to vector<1x8x3xf32>
    tpu.vector_store %arg6[%c0_9, %c0_10, %c0_11], %19 {strides = array<i32>} : memref<1x8x3xf32, #tpu.memory_space<vmem>>, vector<1x8x3xf32>,
    return
  }
  func.func @transform_0(%arg0: i32, %arg1: i32) -> (i32, i32) {
    %c0_i32 = arith.constant 0 : i32
    %c0_i32_0 = arith.constant 0 : i32
    return %arg0, %c0_i32 : i32, i32
  }
  func.func @transform_1(%arg0: i32, %arg1: i32) -> (i32, i32) {
    %c0_i32 = arith.constant 0 : i32
    %c0_i32_0 = arith.constant 0 : i32
    return %arg0, %c0_i32 : i32, i32
  }
  func.func @transform_2(%arg0: i32, %arg1: i32) -> (i32, i32, i32) {
    %c0_i32 = arith.constant 0 : i32
    %c0_i32_0 = arith.constant 0 : i32
    return %arg1, %arg0, %c0_i32 : i32, i32, i32
  }
  func.func @transform_3(%arg0: i32, %arg1: i32) -> (i32, i32) {
    %c0_i32 = arith.constant 0 : i32
    %c0_i32_0 = arith.constant 0 : i32
    return %arg0, %c0_i32 : i32, i32
  }
  func.func @transform_4(%arg0: i32, %arg1: i32) -> (i32, i32, i32) {
    %c0_i32 = arith.constant 0 : i32
    %c0_i32_0 = arith.constant 0 : i32
    return %arg1, %arg0, %c0_i32 : i32, i32, i32
  }
}

</mosaic_0001>

<bundles_post_ra>
// kernel: tpu_custom_call.1
= control target key start
LH: loop header
LB: loop body
LE: loop exit
PB: predicated region body
PF: predicated region fallthrough
CT: control target
= control target key end

     0   :  { %10 = vsyncpa [#allocation3], 0  ;;  %s937_s0 = inlined_call_operand.hbm [shape: f32[8,32], index: 0, kind: input, shape index: {}]   ;;  %s938_s1 = inlined_call_operand.hbm [shape: f32[8,32], index: 1, kind: input, shape index: {}]   ;;  %s939_s2 = inlined_call_operand.hbm [shape: f32[4,8,32], index: 2, kind: input, shape index: {}]   ;;  %s940_s3 = inlined_call_operand.vmem [shape: f32[8,3], index: 3, kind: output, shape index: {0}]   ;;  %s941_s4 = inlined_call_operand.vmem [shape: f32[4,8,3], index: 4, kind: output, shape index: {1}]  }
   0x1   :  { %11 = vsyncpa [#allocation5], 0  ;;  %s731_s15 = smov 0   ;;  %s733_s16 = smov 0  }
   0x2   :  { %s735_s17 = smov 0   ;;  %s737_s18 = smov 0  }
   0x3   :  { %s739_s19 = smov 0   ;;  %s741_s20 = smov 0  }
   0x4 LB: > { %s464_s21 = sadd.s32 4294967295, %s701_s20   ;;  %p103_p0 = scmp.ne.s32.totalorder %s685_s16, %s681_s15  ;;  %s701_s20 = sphi %s741_s20, %s17_s20   ;;  %s697_s19 = sphi %s739_s19, %s959_s19   ;;  %s693_s18 = sphi %s737_s18, %s958_s18   ;;  %s689_s17 = sphi %s735_s17, %s957_s17   ;;  %s685_s16 = sphi %s733_s16, %s956_s16   ;;  %s681_s15 = sphi %s731_s15, %s955_s15  }
   0x5   : > { %p763_p1 = scmp.eq.s32.totalorder %s464_s21, 0  ;;  %p466_p2 = scmp.ge.s32.totalorder %s701_s20, 1 }
   0x6   : > { %p168_p3 = scmp.lt.s32.totalorder %s701_s20, 5  ;;  %s703_s25 = smov [#allocation2]  }
   0x7   : > { %s946_s22 = scalar_select %p763_p1, 1, 0 }
   0x8   : > { %p771_p4 = por %p763_p1, %p103_p0  ;;  %p775_p5 = pnand %p466_p2, %p168_p3 }
   0x9   : > { %s183_s26 = sshll.u32 %s703_s25, 4  ;;  %s704_s27 = smov [#allocation4]   ;;  %s184_s26 = int_to_ptr.vmem [resolvable:$true] %s183_s26 }
   0xa   : > { %s947_s23 = scalar_select %p771_p4, 1, 0 }
   0xb   : > { %s948_s24 = scalar_select %p775_p5, 1, 0 }
   0xc   : > { %p491_p6 = pneg %p775_p5  ;;  %s196_s28 = sshll.u32 %s704_s27, 4  ;;  %s787_s28 = int_to_ptr.vmem [resolvable:$true] %s196_s28 }
   0xd   : > { %s557_s6 = scalar_lea.hbm %s937_s0, 128 }
   0xe   : > { %p783_p7 = pnand %p491_p6, %p763_p1  ;;  %p558_p8 = scmp.ne.s32.totalorder %s937_s0, %s557_s6 }
   0xf   : > { %p564_p12 = scmp.lt.u32.totalorder %s557_s6, %s937_s0 }
  0x10   : > { %p559_p9 = pneg %p783_p7 }
  0x12   : > { %p560_p10 = pnand %p559_p9, %p558_p8 }
  0x14   : > { %p561_p11 = pneg %p560_p10 }
  0x16   : > { %p566_p13 = pnand %p564_p12, %p561_p11 }
  0x18   : > { %569 = shalt.err (!%p566_p13)
}
  0x19   : > { %s570_s11 = scalar_lea.vmem %s184_s26, 128  ;;  %p578_p6 = scmp.lt.s32.totalorder %s184_s26, %s184_s26 }
  0x1a   : > { %p571_p0 = scmp.ne.s32.totalorder %s184_s26, %s570_s11  ;;  %p579_p4 = scmp.lt.s32.totalorder %s570_s11, %s570_s11 }
  0x1c   : > { %p573_p2 = pnand %p571_p0, %p559_p9  ;;  %p580_p1 = por %p579_p4, %p578_p6 }
  0x1e   : > { %p574_p3 = pneg %p573_p2 }
  0x20   : > { %p581_p5 = pnand %p580_p1, %p574_p3 }
  0x22   : > { %584 = shalt.err (!%p581_p5)
}
  0x23   : > { %494 = dma.hbm_to_vmem [thread:$0]  (!%p783_p7), %s937_s0, 128, %s184_s26, [#allocation3]  }
  0x24   : > { %s585_s25 = scalar_lea.hbm %s938_s1, 128 }
  0x25   : > { %p586_p8 = scmp.ne.s32.totalorder %s938_s1, %s585_s25  ;;  %p592_p5 = scmp.lt.u32.totalorder %s585_s25, %s938_s1 }
  0x27   : > { %p588_p4 = pnand %p586_p8, %p559_p9 }
  0x29   : > { %p589_p1 = pneg %p588_p4 }
  0x2b   : > { %p594_p10 = pnand %p592_p5, %p589_p1 }
  0x2d   : > { %597 = shalt.err (!%p594_p10)
}
  0x2e   : > { %s598_s26 = scalar_lea.vmem %s787_s28, 128  ;;  %p606_p0 = scmp.lt.s32.totalorder %s787_s28, %s787_s28 }
  0x2f   : > { %p599_p11 = scmp.ne.s32.totalorder %s787_s28, %s598_s26  ;;  %p607_p2 = scmp.lt.s32.totalorder %s598_s26, %s598_s26 }
  0x31   : > { %p601_p12 = pnand %p599_p11, %p559_p9  ;;  %p608_p3 = por %p607_p2, %p606_p0 }
  0x33   : > { %p602_p13 = pneg %p601_p12 }
  0x35   : > { %p609_p6 = pnand %p608_p3, %p602_p13 }
  0x37   : > { %612 = shalt.err (!%p609_p6)
}
  0x38   : > { %497 = dma.hbm_to_vmem [thread:$0]  (!%p783_p7), %s938_s1, 128, %s787_s28, [#allocation5]  }
  0x39   : > { %s26_s9 = sadd.s32 1, %s697_s19  ;;  %s90_s10 = sadd.s32 1, %s689_s17 }
  0x3a   : > { %p27_p9 = scmp.ge.s32.totalorder %s26_s9, 4  ;;  %p97_p8 = scmp.ne.s32.totalorder %s689_s17, %s685_s16 }
  0x3b   : > { %p98_p4 = scmp.eq.s32.totalorder %s701_s20, 0  ;;  %p504_p1 = scmp.lt.s32.totalorder %s701_s20, 4 }
  0x3c   : > { %s961_s9 = smov (%p27_p9, %s26_s9), 0  ;;  %s207_s29 = sand.u32 1, %s701_s20  }
  0x3d   : > { %p99_p5 = por %p98_p4, %p97_p8  ;;  %s85_s11 = ssub.s32 %s697_s19, %s961_s9 }
  0x3e   : > { %p88_p10 = scmp.eq.s32.totalorder %s85_s11, 0  ;;  %s209_s12 = sand.u32 1, %s689_s17  }
  0x3f   : > { %s470_s13 = sshll.u32 %s209_s12, 3  ;;  %s471_s14 = sshll.u32 %s697_s19, 7 }
  0x40   : > { %s850_s15 = scalar_select %p88_p10, %s689_s17, %s90_s10  }
  0x41   : > { %s855_s27 = scalar_lea.hbm %s939_s2, %s471_s14  ;;  %s211_s30 = scalar_lea.vmem [#allocation6], %s470_s13 }
  0x42   : > { %s219_s5 = sshll.u32 %s211_s30, 4  ;;  %p859_p7 = pnand %p504_p1, %p99_p5  ;;  %s863_s5 = int_to_ptr.vmem [resolvable:$true] %s219_s5 }
  0x43   : > { %s208_s26 = scalar_lea.sflag [#allocation3], %s207_s29  ;;  %s613_s7 = scalar_lea.hbm %s855_s27, 128 }
  0x44   : > { %p614_p11 = scmp.ne.s32.totalorder %s855_s27, %s613_s7  ;;  %p615_p12 = pneg %p859_p7 }
  0x45   : > { %s618_s11 = scalar_lea.hbm %s939_s2, 512  ;;  %p619_p2 = scmp.lt.u32.totalorder %s855_s27, %s939_s2 }
  0x46   : > { %p616_p13 = pnand %p615_p12, %p614_p11  ;;  %p620_p3 = scmp.lt.u32.totalorder %s618_s11, %s613_s7 }
  0x47   : > { %p622_p9 = scmp.lt.u32.totalorder %s613_s7, %s855_s27 }
  0x48   : > { %p617_p0 = pneg %p616_p13  ;;  %p621_p6 = por %p620_p3, %p619_p2 }
  0x4a   : > { %p623_p8 = por %p622_p9, %p621_p6 }
  0x4c   : > { %p624_p4 = pnand %p623_p8, %p617_p0 }
  0x4e   : > { %627 = shalt.err (!%p624_p4)
}
  0x4f   : > { %s628_s29 = scalar_lea.vmem %s863_s5, 128  ;;  %s705_s14 = smov [#allocation6]  }
  0x50   : > { %p629_p1 = scmp.ne.s32.totalorder %s863_s5, %s628_s29  ;;  %s633_s28 = sshll.u32 %s705_s14, 4  ;;  %s634_s28 = int_to_ptr.vmem [resolvable:$false] %s633_s28 }
  0x51   : > { %s635_s25 = scalar_lea.vmem %s634_s28, 256  ;;  %p636_p11 = scmp.lt.s32.totalorder %s863_s5, %s634_s28 }
  0x52   : > { %p631_p5 = pnand %p629_p1, %p615_p12  ;;  %p637_p13 = scmp.lt.s32.totalorder %s635_s25, %s628_s29 }
  0x54   : > { %p632_p10 = pneg %p631_p5  ;;  %p638_p2 = por %p637_p13, %p636_p11 }
  0x56   : > { %p639_p3 = pnand %p638_p2, %p632_p10 }
  0x58   : > { %642 = shalt.err (!%p639_p3)
}
  0x59   : > { %501 = dma.hbm_to_vmem [thread:$0]  (!%p859_p7), %s855_s27, 128, %s863_s5, %s208_s26  }
  0x5a   : > { %p951_p0 = scmp.ne.s32.totalorder %s948_s24, 0 }
  0x5b   : > { %p952_p12 = scmp.ne.s32.totalorder (!%p951_p0), %s946_s22, 0 }
  0x5c   : > { %228 = sbr.rel (%p951_p0) target bundleno = 412 (0x19c), region = 32 }
  0x63   : > { %668 = dma.done.wait (%p952_p12), [#allocation3], 128  }
  0x64   : > { %670 = vsyncadd (%p952_p12), [#allocation3], 4294967168 }
  0x65   : > { %672 = dma.done.wait (%p952_p12), [#allocation5], 128  }
  0x66   : > { %674 = vsyncadd (%p952_p12), [#allocation5], 4294967168  ;;  %s238_s27 = sand.u32 1, %s464_s21   ;;  %s240_s30 = sand.u32 1, %s685_s16  }
  0x67   : > { %s475_s24 = sshll.u32 %s240_s30, 3  ;;  %s239_s5 = scalar_lea.sflag [#allocation3], %s238_s27 }
  0x68   : > { %s242_s6 = scalar_lea.vmem [#allocation6], %s475_s24  ;;  %p953_p7 = scmp.ne.s32.totalorder %s947_s23, 0 }
  0x6a   : > { %676 = dma.done.wait (%p953_p7), %s239_s5, 128  }
  0x6b   : > { %678 = vsyncadd (%p953_p7), %s239_s5, 4294967168  ;;  %p277_p6 = scmp.lt.s32.totalorder %s693_s18, 3  ;;  %v284_v0 = vld [vmem:[#allocation2] sm:$0xff]  ;;  %v285_v1 = vld [vmem:[#allocation4] sm:$0xff]  ;;  %p477_p9 = scmp.ne.s32.totalorder %s693_s18, 0 }
  0x6c   : > { %v286_v2 = vld [vmem:[%s242_s6] sm:$0xff]  ;;  %v291_v3 = vmul.f32 (!%p477_p9), %v284_v0, %v284_v0  ;;  %vm292_vm0 = vcmask (!%p477_p9), 261120   ;;  %v296_v4 = vmul.f32 (!%p477_p9), %v285_v1, %v285_v1  ;;  %v300_v5 = vmul.f32 (!%p477_p9), %v285_v1, %v284_v0 }
  0x6d   : > { %s278_s26 = scalar_select %p277_p6, %s693_s18, 3 }
  0x6e   : > { %290 = sbr.rel (%p477_p9) target bundleno = 260 (0x104), region = 48  ;;  %v293_v6 = vsel (!%p477_p9), %vm292_vm0, %v291_v3, 0.0  ;;  %v301_v7 = vsel (!%p477_p9), %vm292_vm0, %v300_v5, 0.0  ;;  %v297_v8 = vsel (!%p477_p9), %vm292_vm0, %v296_v4, 0.0  ;;  %vm304_vm1 = vcmask (!%p477_p9), 7168  }
  0x6f   : > { %s476_s22 = sshll.u32 %s278_s26, 3  ;;  %294 = vadd.xlane.f32.xlu0 (!%p477_p9), %v293_v6  ;;  %302 = vadd.xlane.f32.xlu1 (!%p477_p9), %v301_v7  ;;  %vm306_vm2 = vcmask (!%p477_p9), 15360   ;;  %vm308_vm3 = vcmask (!%p477_p9), 23552  }
  0x70   : > { %s912_s10 = scalar_lea.vmem %s941_s4, %s476_s22 }
  0x73   : > { %298 = vadd.xlane.f32.xlu0 (!%p477_p9), %v297_v8 }
  0xfc   : > { %v295_v9 = vpop.xlane.xlu0 %294  ;;  %v303_v10 = vpop.xlane.xlu1 %302 }
 0x100   : > { %v299_v11 = vpop.xlane.xlu0 %298 }
 0x101   : > { %v305_v12 = vsel %vm304_vm1, %v295_v9, %v299_v11 }
 0x102   : > { %v307_v13 = vsel %vm306_vm2, %v305_v12, %v303_v10 }
 0x103   : > { %309 = vst.msk [vmem:[%s940_s3] sm:$0xff] %vm308_vm3, %v307_v13 }
 0x104 PF: > { %v310_v14 = vmul.f32 %v286_v2, %v286_v2  ;;  %vm311_vm4 = vcmask 261120   ;;  %v315_v15 = vmul.f32 %v286_v2, %v284_v0  ;;  %v319_v16 = vmul.f32 %v286_v2, %v285_v1 }
 0x105   : > { %vm323_vm5 = vcmask 7168   ;;  %vm325_vm6 = vcmask 15360   ;;  %vm327_vm7 = vcmask 23552  }
 0x106   : > { %v312_v17 = vsel %vm311_vm4, %v310_v14, 0.0  ;;  %v320_v18 = vsel %vm311_vm4, %v319_v16, 0.0  ;;  %v316_v19 = vsel %vm311_vm4, %v315_v15, 0.0 }
 0x107   : > { %313 = vadd.xlane.f32.xlu0 %v312_v17  ;;  %321 = vadd.xlane.f32.xlu1 %v320_v18 }
 0x10b   : > { %317 = vadd.xlane.f32.xlu0 %v316_v19 }
 0x194   : > { %v314_v20 = vpop.xlane.xlu0 %313  ;;  %v322_v21 = vpop.xlane.xlu1 %321 }
 0x198   : > { %v318_v22 = vpop.xlane.xlu0 %317 }
 0x199   : > { %v324_v23 = vsel %vm323_vm5, %v314_v20, %v318_v22 }
 0x19a   : > { %v326_v24 = vsel %vm325_vm6, %v324_v23, %v322_v21 }
 0x19b   : > { %328 = vst.msk [vmem:[%s912_s10] sm:$0xff] %vm327_vm7, %v326_v24 }
 0x19c PF: > { %s17_s20 = sadd.s32 1, %s701_s20   ;;  %s954_s23 = smov %s850_s15 }
 0x19d   : > { %p14_p8 = scmp.ge.s32.totalorder %s17_s20, 6   ;;  %s955_s15 = smov %s685_s16 }
 0x19e   : > { %s956_s16 = smov %s689_s17  ;;  %s957_s17 = smov %s954_s23 }
 0x19f   : > { %s958_s18 = smov %s697_s19  ;;  %s959_s19 = smov %s961_s9 }
 0x1a0   :  { %16 = sbr.rel (!%p14_p8) target bundleno = 4 (0x4), region = 97 }
 0x1a7   :  { %368 = vsyncpa [#allocation3], 1 }
 0x1a8   :  { %370 = vsyncpa [#allocation3 + $0x1], 1 }
 0x1a9   :  { %371 = vsyncpa [#allocation5], 1 }

</bundles_post_ra>
